<compile_context>
chip_gen: v5e
topology: v5e:2x2
jax: 0.10.0
libtpu: 0.0.40
codegen_flags: <defaults>
</compile_context>

<pallas_src>
import jax
import jax.numpy as jnp
from jax.experimental import pallas as pl
from jax.experimental.pallas import tpu as pltpu

HIDDEN = 128                 # hidden_dim
LLM_IN = 64                  # LLM-advice feature vector length
MATH_IN = 64 + 10 + 4        # 78 mathematical-signature features
MATH_IN_PAD = 128            # zero-padded (exact) to a lane-friendly width
NUM_HEADS = 8
STATE_DIM = 32               # state_dim (small, chosen for the demo)

N_WEIGHT_BLOCKS = 7          # 7 x (128,128) blocks stacked -> (896,128) slab
N_BIAS_ROWS = 16             # 12 used rows + 4 zero rows -> (16,128) slab


def _layernorm(x, gamma, beta, eps=1e-5):
    # matches torch.nn.LayerNorm (biased variance, eps=1e-5)
    mean = jnp.mean(x, axis=-1, keepdims=True)
    var = jnp.mean((x - mean) ** 2, axis=-1, keepdims=True)
    return (x - mean) * jax.lax.rsqrt(var + eps) * gamma + beta


def _gelu(x):
    # exact (erf-based) GELU, matching torch.nn.GELU() default
    return 0.5 * x * (1.0 + jax.lax.erf(x * (1.0 / jnp.sqrt(2.0))))


def integrator_kernel(feat_ref, w_ref, b_ref, out_ref):
    f32 = jnp.float32

    def W(i, n=1):                        # static (128*n, 128) weight block
        return w_ref[i * HIDDEN:(i + n) * HIDDEN, :]

    def B(i):                             # static (1, 128) bias/affine row
        return b_ref[i:i + 1, :]

    x = feat_ref[0:1, :]                  # (1,128) llm features (zero-padded, exact)
    m = feat_ref[1:2, :]                  # (1,128) math features (zero-padded, exact)

    # --- llm_reasoning_encoder: Linear(64,128) -> LayerNorm -> GELU -> Linear(128,128)
    h = jnp.dot(x, W(0), preferred_element_type=f32) + B(0)
    h = _gelu(_layernorm(h, B(1), B(2)))
    llm_enc = jnp.dot(h, W(1), preferred_element_type=f32) + B(3)

    # --- mathematical_encoder: Linear(78,128) -> LayerNorm -> GELU -> Linear(128,128)
    hm = jnp.dot(m, W(2), preferred_element_type=f32) + B(4)
    hm = _gelu(_layernorm(hm, B(5), B(6)))
    math_enc = jnp.dot(hm, W(3), preferred_element_type=f32) + B(7)

    # --- cross_modal_attention + knowledge_projector[0], folded:
    # softmax over one key is identically 1, so the attention output equals
    # out_proj(v_proj(llm_enc)); (wv @ wo @ wk1a) and its bias were folded
    # host-side into W(4..5) / B(8). cat([fused, math_enc]) @ wk1 thus becomes
    # a single K=256 MXU contraction.
    hk_lhs = jnp.concatenate([llm_enc, math_enc], axis=-1)       # (1, 256)
    hk = jnp.dot(hk_lhs, W(4, 2), preferred_element_type=f32) + B(8)
    hk = _gelu(_layernorm(hk, B(9), B(10)))

    # --- final projection (Linear(128, state_dim)), lane-dense (padded 32 -> 128)
    out_ref[...] = jnp.dot(hk, W(6), preferred_element_type=f32) + B(11)


def make_params(key):
    """Deterministic synthetic parameters with the module's shapes (stored as (in, out))."""
    ks = jax.random.split(key, 8)

    def lin(k, fan_in, fan_out):
        kw, kb = jax.random.split(k)
        lim = 1.0 / jnp.sqrt(jnp.float32(fan_in))
        w = jax.random.uniform(kw, (fan_in, fan_out), jnp.float32, -lim, lim)
        b = jax.random.uniform(kb, (1, fan_out), jnp.float32, -lim, lim)
        return w, b

    p = {}
    # llm_reasoning_encoder
    p["wl1"], p["bl1"] = lin(ks[0], LLM_IN, HIDDEN)
    p["gl"] = jnp.ones((1, HIDDEN), jnp.float32)
    p["betl"] = jnp.zeros((1, HIDDEN), jnp.float32)
    p["wl2"], p["bl2"] = lin(ks[1], HIDDEN, HIDDEN)
    # mathematical_encoder (first weight zero-padded on the input axis 78 -> 128)
    wm1, p["bm1"] = lin(ks[2], MATH_IN, HIDDEN)
    p["wm1"] = jnp.pad(wm1, ((0, MATH_IN_PAD - MATH_IN), (0, 0)))
    p["gm"] = jnp.ones((1, HIDDEN), jnp.float32)
    p["betm"] = jnp.zeros((1, HIDDEN), jnp.float32)
    p["wm2"], p["bm2"] = lin(ks[3], HIDDEN, HIDDEN)
    # cross_modal_attention: only the value slice of in_proj and out_proj matter
    # (q/k projections provably cancel for a length-1 key sequence).
    p["wv"], p["bv"] = lin(ks[4], HIDDEN, HIDDEN)
    p["wo"], p["bo"] = lin(ks[5], HIDDEN, HIDDEN)
    # knowledge_projector: Linear(256,128) split into two 128x128 halves
    wk1, p["bk1"] = lin(ks[6], 2 * HIDDEN, HIDDEN)
    p["wk1a"], p["wk1b"] = wk1[:HIDDEN], wk1[HIDDEN:]
    p["gk"] = jnp.ones((1, HIDDEN), jnp.float32)
    p["betk"] = jnp.zeros((1, HIDDEN), jnp.float32)
    p["wk2"], p["bk2"] = lin(ks[7], HIDDEN, STATE_DIM)
    return p


def pack_params(p):
    """Host-side one-time prep: fold attention projections and pack DMA slabs."""
    # Fold: fused = llm_enc @ (wv@wo) + (bv@wo + bo); fused @ wk1a becomes
    # llm_enc @ (wv@wo@wk1a) + ((bv@wo + bo) @ wk1a). Exact up to f32 rounding.
    w_fold = p["wv"] @ p["wo"] @ p["wk1a"]                         # (128,128)
    b_fold = (p["bv"] @ p["wo"] + p["bo"]) @ p["wk1a"]             # (1,128)
    wk_merged = jnp.concatenate([w_fold, p["wk1b"]], axis=0)       # (256,128)
    bk_merged = b_fold + p["bk1"]                                  # (1,128)

    wl1_pad = jnp.pad(p["wl1"], ((0, HIDDEN - LLM_IN), (0, 0)))    # (128,128)
    wk2_pad = jnp.pad(p["wk2"], ((0, 0), (0, HIDDEN - STATE_DIM))) # (128,128)
    bk2_pad = jnp.pad(p["bk2"], ((0, 0), (0, HIDDEN - STATE_DIM))) # (1,128)

    w_slab = jnp.concatenate(
        [wl1_pad, p["wl2"], p["wm1"], p["wm2"], wk_merged, wk2_pad],
        axis=0).astype(jnp.float32)                                # (896,128)
    assert w_slab.shape == (N_WEIGHT_BLOCKS * HIDDEN, HIDDEN)

    b_rows = [p["bl1"], p["gl"], p["betl"], p["bl2"],
              p["bm1"], p["gm"], p["betm"], p["bm2"],
              bk_merged, p["gk"], p["betk"], bk2_pad]
    pad_rows = jnp.zeros((N_BIAS_ROWS - len(b_rows), HIDDEN), jnp.float32)
    b_slab = jnp.concatenate(b_rows + [pad_rows], axis=0).astype(jnp.float32)
    assert b_slab.shape == (N_BIAS_ROWS, HIDDEN)
    return w_slab, b_slab


def integrator_forward(packed, llm_feat, math_feat, current_state):
    """Wrapper matching RevolutionaryKnowledgeIntegrator.forward semantics."""
    w_slab, b_slab = packed
    batch_size = current_state.shape[0]

    llm_row = jnp.pad(llm_feat.reshape(1, LLM_IN).astype(jnp.float32),
                      ((0, 0), (0, HIDDEN - LLM_IN)))
    math_row = jnp.pad(math_feat.reshape(1, MATH_IN).astype(jnp.float32),
                       ((0, 0), (0, MATH_IN_PAD - MATH_IN)))
    feat = jnp.concatenate([llm_row, math_row], axis=0)            # (2,128), one DMA

    out = pl.pallas_call(
        integrator_kernel,
        out_shape=jax.ShapeDtypeStruct((1, HIDDEN), jnp.float32),  # lane-dense
        in_specs=[pl.BlockSpec(memory_space=pltpu.MemorySpace.VMEM)] * 3,
        out_specs=pl.BlockSpec(memory_space=pltpu.MemorySpace.VMEM),
    )(feat, w_slab, b_slab)

    out = out[:, :STATE_DIM]                                       # drop padding cols
    if batch_size > 1:
        # torch `.expand(batch_size, -1)`
        return jnp.broadcast_to(out, (batch_size, STATE_DIM))
    return out[0]  # `.squeeze(0)` when batch_size == 1


if __name__ == "__main__":
    key = jax.random.PRNGKey(0)
    pkey, mkey, skey = jax.random.split(key, 3)
    params = make_params(pkey)
    packed = pack_params(params)   # one-time host prep; keep resident across calls

    # Host-side glue equivalent of _encode_llm_advice (pure Python/string feature
    # construction in the reference module), producing the 64-d feature vector.
    action_one_hot = jnp.zeros(4).at[jnp.array([0, 2])].set(1.0)
    llm_feat = jnp.concatenate([
        action_one_hot,                               # actions one-hot (4)
        jnp.array([0.8]),                             # confidence (1)
        jnp.array([3.0]),                             # len(reasoning) (1)
        jnp.array([0.1, -0.2, 0.3, 0.0]),             # causal effects (4)
        jnp.zeros(8).at[1].set(1.0),                  # strategy 'ACTIVE' (8)
        jnp.zeros(8).at[0].set(1.0).at[1].set(1.0),   # reasoning quality (8)
        jnp.zeros(8).at[0].set(2.0 / 5.0),            # planning (8)
        jnp.zeros(8),                                 # temporal (8)
        jnp.zeros(8).at[0].set(0.5),                  # response complexity (8)
    ])
    llm_feat = jnp.pad(llm_feat, (0, LLM_IN - llm_feat.shape[0]))     # -> (64,)

    # Host-side glue equivalent of _encode_mathematical_signatures (78 features).
    k1, k2, k3 = jax.random.split(mkey, 3)
    math_feat = jnp.concatenate([
        jax.random.normal(k1, (64,)),   # homological_features
        jax.random.normal(k2, (10,)),   # heat_kernel_trace
        jax.random.normal(k3, (4,)),    # information-geometric features
    ])

    current_state = jax.random.normal(skey, (2, STATE_DIM))           # batch = 2

    out = integrator_forward(packed, llm_feat, math_feat, current_state)
    out = jax.block_until_ready(out)
    assert out.shape == (2, STATE_DIM) and out.dtype == jnp.float32
    print("KERNEL_OK")
</pallas_src>

<mosaic_0001>
module attributes {stable_mosaic.version = 11 : i64} {
  func.func @integrator_kernel(%arg0: memref<2x128xf32, #tpu.memory_space<vmem>>, %arg1: memref<896x128xf32, #tpu.memory_space<vmem>>, %arg2: memref<16x128xf32, #tpu.memory_space<vmem>>, %arg3: memref<1x128xf32, #tpu.memory_space<vmem>>) attributes {dimension_semantics = [], scalar_prefetch = 0 : i64, scratch_operands = 0 : i64, tpu.core_type = #tpu.core_type<tc>} {
    %c0 = arith.constant 0 : index
    %c0_0 = arith.constant 0 : index
    %0 = vector.load %arg0[%c0, %c0_0] : memref<2x128xf32, #tpu.memory_space<vmem>>, vector<1x128xf32>
    %c1 = arith.constant 1 : index
    %c0_1 = arith.constant 0 : index
    %1 = vector.load %arg0[%c1, %c0_1] : memref<2x128xf32, #tpu.memory_space<vmem>>, vector<1x128xf32>
    %c0_2 = arith.constant 0 : index
    %c0_3 = arith.constant 0 : index
    %2 = vector.load %arg1[%c0_2, %c0_3] : memref<896x128xf32, #tpu.memory_space<vmem>>, vector<128x128xf32>
    %cst = arith.constant dense<0.000000e+00> : vector<1x128xf32>
    %3 = tpu.matmul %0, %2, %cst {dimension_numbers = #tpu.dot_dimension_numbers<[1], [0], [0], [1], [0, 0, 1, 1], [], []>} : vector<1x128xf32>, vector<128x128xf32>, vector<1x128xf32> -> vector<1x128xf32>
    %c0_4 = arith.constant 0 : index
    %c0_5 = arith.constant 0 : index
    %4 = vector.load %arg2[%c0_4, %c0_5] : memref<16x128xf32, #tpu.memory_space<vmem>>, vector<1x128xf32>
    %5 = arith.addf %3, %4 : vector<1x128xf32>
    %c1_6 = arith.constant 1 : index
    %c0_7 = arith.constant 0 : index
    %6 = vector.load %arg2[%c1_6, %c0_7] : memref<16x128xf32, #tpu.memory_space<vmem>>, vector<1x128xf32>
    %c2 = arith.constant 2 : index
    %c0_8 = arith.constant 0 : index
    %7 = vector.load %arg2[%c2, %c0_8] : memref<16x128xf32, #tpu.memory_space<vmem>>, vector<1x128xf32>
    %cst_9 = arith.constant dense<0.000000e+00> : vector<1xf32>
    %8 = vector.multi_reduction <add>, %5, %cst_9 [1] : vector<1x128xf32> to vector<1xf32>
    %9 = vector.shape_cast %8 : vector<1xf32> to vector<1x1xf32>
    %cst_10 = arith.constant 1.280000e+02 : f32
    %10 = vector.broadcast %cst_10 : f32 to vector<1x1xf32>
    %11 = arith.divf %9, %10 : vector<1x1xf32>
    %12 = vector.broadcast %11 : vector<1x1xf32> to vector<1x128xf32>
    %13 = arith.subf %5, %12 : vector<1x128xf32>
    %14 = arith.mulf %13, %13 : vector<1x128xf32>
    %cst_11 = arith.constant dense<0.000000e+00> : vector<1xf32>
    %15 = vector.multi_reduction <add>, %14, %cst_11 [1] : vector<1x128xf32> to vector<1xf32>
    %16 = vector.shape_cast %15 : vector<1xf32> to vector<1x1xf32>
    %cst_12 = arith.constant 1.280000e+02 : f32
    %17 = vector.broadcast %cst_12 : f32 to vector<1x1xf32>
    %18 = arith.divf %16, %17 : vector<1x1xf32>
    %19 = vector.broadcast %11 : vector<1x1xf32> to vector<1x128xf32>
    %20 = arith.subf %5, %19 : vector<1x128xf32>
    %cst_13 = arith.constant 9.99999974E-6 : f32
    %21 = vector.broadcast %cst_13 : f32 to vector<1x1xf32>
    %22 = arith.addf %18, %21 : vector<1x1xf32>
    %23 = math.rsqrt %22 : vector<1x1xf32>
    %24 = vector.broadcast %23 : vector<1x1xf32> to vector<1x128xf32>
    %25 = arith.mulf %20, %24 : vector<1x128xf32>
    %26 = arith.mulf %25, %6 : vector<1x128xf32>
    %27 = arith.addf %26, %7 : vector<1x128xf32>
    %cst_14 = arith.constant 5.000000e-01 : f32
    %28 = vector.broadcast %cst_14 : f32 to vector<1x128xf32>
    %29 = arith.mulf %28, %27 : vector<1x128xf32>
    %cst_15 = arith.constant 2.000000e+00 : f32
    %30 = math.sqrt %cst_15 : f32
    %cst_16 = arith.constant 1.000000e+00 : f32
    %31 = arith.divf %cst_16, %30 : f32
    %32 = vector.broadcast %31 : f32 to vector<1x128xf32>
    %33 = arith.mulf %27, %32 : vector<1x128xf32>
    %34 = math.erf %33 : vector<1x128xf32>
    %cst_17 = arith.constant 1.000000e+00 : f32
    %35 = vector.broadcast %cst_17 : f32 to vector<1x128xf32>
    %36 = arith.addf %35, %34 : vector<1x128xf32>
    %37 = arith.mulf %29, %36 : vector<1x128xf32>
    %c128 = arith.constant 128 : index
    %c0_18 = arith.constant 0 : index
    %38 = vector.load %arg1[%c128, %c0_18] : memref<896x128xf32, #tpu.memory_space<vmem>>, vector<128x128xf32>
    %cst_19 = arith.constant dense<0.000000e+00> : vector<1x128xf32>
    %39 = tpu.matmul %37, %38, %cst_19 {dimension_numbers = #tpu.dot_dimension_numbers<[1], [0], [0], [1], [0, 0, 1, 1], [], []>} : vector<1x128xf32>, vector<128x128xf32>, vector<1x128xf32> -> vector<1x128xf32>
    %c3 = arith.constant 3 : index
    %c0_20 = arith.constant 0 : index
    %40 = vector.load %arg2[%c3, %c0_20] : memref<16x128xf32, #tpu.memory_space<vmem>>, vector<1x128xf32>
    %41 = arith.addf %39, %40 : vector<1x128xf32>
    %c256 = arith.constant 256 : index
    %c0_21 = arith.constant 0 : index
    %42 = vector.load %arg1[%c256, %c0_21] : memref<896x128xf32, #tpu.memory_space<vmem>>, vector<128x128xf32>
    %cst_22 = arith.constant dense<0.000000e+00> : vector<1x128xf32>
    %43 = tpu.matmul %1, %42, %cst_22 {dimension_numbers = #tpu.dot_dimension_numbers<[1], [0], [0], [1], [0, 0, 1, 1], [], []>} : vector<1x128xf32>, vector<128x128xf32>, vector<1x128xf32> -> vector<1x128xf32>
    %c4 = arith.constant 4 : index
    %c0_23 = arith.constant 0 : index
    %44 = vector.load %arg2[%c4, %c0_23] : memref<16x128xf32, #tpu.memory_space<vmem>>, vector<1x128xf32>
    %45 = arith.addf %43, %44 : vector<1x128xf32>
    %c5 = arith.constant 5 : index
    %c0_24 = arith.constant 0 : index
    %46 = vector.load %arg2[%c5, %c0_24] : memref<16x128xf32, #tpu.memory_space<vmem>>, vector<1x128xf32>
    %c6 = arith.constant 6 : index
    %c0_25 = arith.constant 0 : index
    %47 = vector.load %arg2[%c6, %c0_25] : memref<16x128xf32, #tpu.memory_space<vmem>>, vector<1x128xf32>
    %cst_26 = arith.constant dense<0.000000e+00> : vector<1xf32>
    %48 = vector.multi_reduction <add>, %45, %cst_26 [1] : vector<1x128xf32> to vector<1xf32>
    %49 = vector.shape_cast %48 : vector<1xf32> to vector<1x1xf32>
    %cst_27 = arith.constant 1.280000e+02 : f32
    %50 = vector.broadcast %cst_27 : f32 to vector<1x1xf32>
    %51 = arith.divf %49, %50 : vector<1x1xf32>
    %52 = vector.broadcast %51 : vector<1x1xf32> to vector<1x128xf32>
    %53 = arith.subf %45, %52 : vector<1x128xf32>
    %54 = arith.mulf %53, %53 : vector<1x128xf32>
    %cst_28 = arith.constant dense<0.000000e+00> : vector<1xf32>
    %55 = vector.multi_reduction <add>, %54, %cst_28 [1] : vector<1x128xf32> to vector<1xf32>
    %56 = vector.shape_cast %55 : vector<1xf32> to vector<1x1xf32>
    %cst_29 = arith.constant 1.280000e+02 : f32
    %57 = vector.broadcast %cst_29 : f32 to vector<1x1xf32>
    %58 = arith.divf %56, %57 : vector<1x1xf32>
    %59 = vector.broadcast %51 : vector<1x1xf32> to vector<1x128xf32>
    %60 = arith.subf %45, %59 : vector<1x128xf32>
    %cst_30 = arith.constant 9.99999974E-6 : f32
    %61 = vector.broadcast %cst_30 : f32 to vector<1x1xf32>
    %62 = arith.addf %58, %61 : vector<1x1xf32>
    %63 = math.rsqrt %62 : vector<1x1xf32>
    %64 = vector.broadcast %63 : vector<1x1xf32> to vector<1x128xf32>
    %65 = arith.mulf %60, %64 : vector<1x128xf32>
    %66 = arith.mulf %65, %46 : vector<1x128xf32>
    %67 = arith.addf %66, %47 : vector<1x128xf32>
    %cst_31 = arith.constant 5.000000e-01 : f32
    %68 = vector.broadcast %cst_31 : f32 to vector<1x128xf32>
    %69 = arith.mulf %68, %67 : vector<1x128xf32>
    %cst_32 = arith.constant 2.000000e+00 : f32
    %70 = math.sqrt %cst_32 : f32
    %cst_33 = arith.constant 1.000000e+00 : f32
    %71 = arith.divf %cst_33, %70 : f32
    %72 = vector.broadcast %71 : f32 to vector<1x128xf32>
    %73 = arith.mulf %67, %72 : vector<1x128xf32>
    %74 = math.erf %73 : vector<1x128xf32>
    %cst_34 = arith.constant 1.000000e+00 : f32
    %75 = vector.broadcast %cst_34 : f32 to vector<1x128xf32>
    %76 = arith.addf %75, %74 : vector<1x128xf32>
    %77 = arith.mulf %69, %76 : vector<1x128xf32>
    %c384 = arith.constant 384 : index
    %c0_35 = arith.constant 0 : index
    %78 = vector.load %arg1[%c384, %c0_35] : memref<896x128xf32, #tpu.memory_space<vmem>>, vector<128x128xf32>
    %cst_36 = arith.constant dense<0.000000e+00> : vector<1x128xf32>
    %79 = tpu.matmul %77, %78, %cst_36 {dimension_numbers = #tpu.dot_dimension_numbers<[1], [0], [0], [1], [0, 0, 1, 1], [], []>} : vector<1x128xf32>, vector<128x128xf32>, vector<1x128xf32> -> vector<1x128xf32>
    %c7 = arith.constant 7 : index
    %c0_37 = arith.constant 0 : index
    %80 = vector.load %arg2[%c7, %c0_37] : memref<16x128xf32, #tpu.memory_space<vmem>>, vector<1x128xf32>
    %81 = arith.addf %79, %80 : vector<1x128xf32>
    %82 = tpu.concatenate %41, %81 in 1 : vector<1x128xf32>, vector<1x128xf32> -> vector<1x256xf32>
    %c512 = arith.constant 512 : index
    %c0_38 = arith.constant 0 : index
    %83 = vector.load %arg1[%c512, %c0_38] : memref<896x128xf32, #tpu.memory_space<vmem>>, vector<256x128xf32>
    %cst_39 = arith.constant dense<0.000000e+00> : vector<1x128xf32>
    %84 = tpu.matmul %82, %83, %cst_39 {dimension_numbers = #tpu.dot_dimension_numbers<[1], [0], [0], [1], [0, 0, 1, 1], [], []>} : vector<1x256xf32>, vector<256x128xf32>, vector<1x128xf32> -> vector<1x128xf32>
    %c8 = arith.constant 8 : index
    %c0_40 = arith.constant 0 : index
    %85 = vector.load %arg2[%c8, %c0_40] : memref<16x128xf32, #tpu.memory_space<vmem>>, vector<1x128xf32>
    %86 = arith.addf %84, %85 : vector<1x128xf32>
    %c9 = arith.constant 9 : index
    %c0_41 = arith.constant 0 : index
    %87 = vector.load %arg2[%c9, %c0_41] : memref<16x128xf32, #tpu.memory_space<vmem>>, vector<1x128xf32>
    %c10 = arith.constant 10 : index
    %c0_42 = arith.constant 0 : index
    %88 = vector.load %arg2[%c10, %c0_42] : memref<16x128xf32, #tpu.memory_space<vmem>>, vector<1x128xf32>
    %cst_43 = arith.constant dense<0.000000e+00> : vector<1xf32>
    %89 = vector.multi_reduction <add>, %86, %cst_43 [1] : vector<1x128xf32> to vector<1xf32>
    %90 = vector.shape_cast %89 : vector<1xf32> to vector<1x1xf32>
    %cst_44 = arith.constant 1.280000e+02 : f32
    %91 = vector.broadcast %cst_44 : f32 to vector<1x1xf32>
    %92 = arith.divf %90, %91 : vector<1x1xf32>
    %93 = vector.broadcast %92 : vector<1x1xf32> to vector<1x128xf32>
    %94 = arith.subf %86, %93 : vector<1x128xf32>
    %95 = arith.mulf %94, %94 : vector<1x128xf32>
    %cst_45 = arith.constant dense<0.000000e+00> : vector<1xf32>
    %96 = vector.multi_reduction <add>, %95, %cst_45 [1] : vector<1x128xf32> to vector<1xf32>
    %97 = vector.shape_cast %96 : vector<1xf32> to vector<1x1xf32>
    %cst_46 = arith.constant 1.280000e+02 : f32
    %98 = vector.broadcast %cst_46 : f32 to vector<1x1xf32>
    %99 = arith.divf %97, %98 : vector<1x1xf32>
    %100 = vector.broadcast %92 : vector<1x1xf32> to vector<1x128xf32>
    %101 = arith.subf %86, %100 : vector<1x128xf32>
    %cst_47 = arith.constant 9.99999974E-6 : f32
    %102 = vector.broadcast %cst_47 : f32 to vector<1x1xf32>
    %103 = arith.addf %99, %102 : vector<1x1xf32>
    %104 = math.rsqrt %103 : vector<1x1xf32>
    %105 = vector.broadcast %104 : vector<1x1xf32> to vector<1x128xf32>
    %106 = arith.mulf %101, %105 : vector<1x128xf32>
    %107 = arith.mulf %106, %87 : vector<1x128xf32>
    %108 = arith.addf %107, %88 : vector<1x128xf32>
    %cst_48 = arith.constant 5.000000e-01 : f32
    %109 = vector.broadcast %cst_48 : f32 to vector<1x128xf32>
    %110 = arith.mulf %109, %108 : vector<1x128xf32>
    %cst_49 = arith.constant 2.000000e+00 : f32
    %111 = math.sqrt %cst_49 : f32
    %cst_50 = arith.constant 1.000000e+00 : f32
    %112 = arith.divf %cst_50, %111 : f32
    %113 = vector.broadcast %112 : f32 to vector<1x128xf32>
    %114 = arith.mulf %108, %113 : vector<1x128xf32>
    %115 = math.erf %114 : vector<1x128xf32>
    %cst_51 = arith.constant 1.000000e+00 : f32
    %116 = vector.broadcast %cst_51 : f32 to vector<1x128xf32>
    %117 = arith.addf %116, %115 : vector<1x128xf32>
    %118 = arith.mulf %110, %117 : vector<1x128xf32>
    %c768 = arith.constant 768 : index
    %c0_52 = arith.constant 0 : index
    %119 = vector.load %arg1[%c768, %c0_52] : memref<896x128xf32, #tpu.memory_space<vmem>>, vector<128x128xf32>
    %cst_53 = arith.constant dense<0.000000e+00> : vector<1x128xf32>
    %120 = tpu.matmul %118, %119, %cst_53 {dimension_numbers = #tpu.dot_dimension_numbers<[1], [0], [0], [1], [0, 0, 1, 1], [], []>} : vector<1x128xf32>, vector<128x128xf32>, vector<1x128xf32> -> vector<1x128xf32>
    %c11 = arith.constant 11 : index
    %c0_54 = arith.constant 0 : index
    %121 = vector.load %arg2[%c11, %c0_54] : memref<16x128xf32, #tpu.memory_space<vmem>>, vector<1x128xf32>
    %122 = arith.addf %120, %121 : vector<1x128xf32>
    %c0_55 = arith.constant 0 : index
    %c0_56 = arith.constant 0 : index
    %123 = vector.load %arg3[%c0_55, %c0_56] : memref<1x128xf32, #tpu.memory_space<vmem>>, vector<1x128xf32>
    tpu.vector_store %arg3[%c0_55, %c0_56], %122 {strides = array<i32>} : memref<1x128xf32, #tpu.memory_space<vmem>>, vector<1x128xf32>,
    return
  }
}

</mosaic_0001>

<bundles_post_ra>
// kernel: tpu_custom_call.1
= control target key start
LH: loop header
LB: loop body
LE: loop exit
PB: predicated region body
PF: predicated region fallthrough
CT: control target
= control target key end

     0   :  { %8 = vsyncpa [#allocation3], 0  ;;  %s783_s0 = inlined_call_operand.hbm [shape: f32[2,128], index: 0, kind: input, shape index: {}]   ;;  %s784_s1 = inlined_call_operand.hbm [shape: f32[896,128], index: 1, kind: input, shape index: {}]   ;;  %s785_s2 = inlined_call_operand.hbm [shape: f32[16,128], index: 2, kind: input, shape index: {}]   ;;  %s786_s3 = inlined_call_operand.hbm [shape: f32[1,128], index: 3, kind: output, shape index: {}]  }
   0x1   :  { %9 = vsyncpa [#allocation6], 0  ;;  %s26_s14 = sshll.u32 %s784_s1, 4  ;;  %s27_s14 = int_to_ptr.hbm [resolvable:$true] %s26_s14 }
   0x2   :  { %10 = vsyncpa [#allocation4], 0  ;;  %s683_s15 = smov [#allocation5]   ;;  %s16_s19 = sshll.u32 %s783_s0, 4  ;;  %s17_s19 = int_to_ptr.hbm [resolvable:$true] %s16_s19 }
   0x3   :  { %s28_s16 = sshll.u32 %s683_s15, 4  ;;  %s684_s20 = smov 128   ;;  %s29_s16 = int_to_ptr.vmem [resolvable:$true] %s28_s16 }
   0x4   :  { %s685_s21 = smov 8   ;;  %s686_s22 = smov [#allocation2]  }
   0x5   :  { %34 = dma.hbm_to_vmem [thread:$0]  %s27_s14, 14336, %s29_s16, [#allocation6], %s684_s20, %s684_s20, %s685_s21  }
   0x6   :  { %s18_s23 = sshll.u32 %s686_s22, 4  ;;  %s39_s26 = sshll.u32 %s785_s2, 4  ;;  %s19_s23 = int_to_ptr.vmem [resolvable:$true] %s18_s23  ;;  %s40_s26 = int_to_ptr.hbm [resolvable:$true] %s39_s26 }
   0x7   :  { %21 = dma.hbm_to_vmem [thread:$0]  %s17_s19, 32, %s19_s23, [#allocation3]  }
   0x8   :  { %s687_s1 = smov [#allocation7]  }
   0x9   :  { %s41_s27 = sshll.u32 %s687_s1, 4  ;;  %s42_s27 = int_to_ptr.vmem [resolvable:$true] %s41_s27 }
   0xa   :  { %47 = dma.hbm_to_vmem [thread:$0]  %s40_s26, 256, %s42_s27, [#allocation6], %s684_s20, %s684_s20, %s685_s21  }
   0xb   :  { %677 = dma.done.wait [#allocation3], 32  }
   0xc   :  { %678 = vsyncadd [#allocation3], 4294967264 }
   0xd   :  { %679 = dma.done.wait [#allocation6], 14592  }
   0xe   :  { %680 = vsyncadd [#allocation6], 4294952704  ;;  %v229_v0 = vld [vmem:[#allocation5 + $0x178] sm:$0xff]  ;;  %v228_v1 = vld [vmem:[#allocation5 + $0x170] sm:$0xff]  ;;  %vm101_vm0 = vcmask 1040384   ;;  %v688_v42 = vmov 128.0  }
   0xf   :  { %231 = vmatpush.msra.mxu2 %v229_v0  ;;  %v227_v2 = vld [vmem:[#allocation5 + $0x168] sm:$0xff]  ;;  %v77_v3 = vld [vmem:[#allocation5 + $0x78] sm:$0xff]  ;;  %v76_v4 = vld [vmem:[#allocation5 + $0x70] sm:$0xff]  ;;  %567 = vrcp.f32 %v688_v42  ;;  %s689_s0 = smov [#allocation8]   ;;  %s546_s30 = sshll.u32 %s786_s3, 4  ;;  %s547_s30 = int_to_ptr.hbm [resolvable:$true] %s546_s30 }
  0x10   :  { %79 = vmatpush.msra.mxu0 %v77_v3  ;;  %v226_v5 = vld [vmem:[#allocation5 + $0x160] sm:$0xff]  ;;  %v75_v6 = vld [vmem:[#allocation5 + $0x68] sm:$0xff]  ;;  %v225_v7 = vld [vmem:[#allocation5 + $0x158] sm:$0xff]  ;;  %s544_s2 = sshll.u32 %s689_s0, 4  ;;  %s545_s2 = int_to_ptr.vmem [resolvable:$true] %s544_s2 }
  0x11   :  { %232 = vmatpush.msra.mxu2 %v228_v1  ;;  %v74_v8 = vld [vmem:[#allocation5 + $0x60] sm:$0xff]  ;;  %v224_v9 = vld [vmem:[#allocation5 + $0x150] sm:$0xff]  ;;  %v73_v10 = vld [vmem:[#allocation5 + $0x58] sm:$0xff] }
  0x12   :  { %80 = vmatpush.msra.mxu0 %v76_v4  ;;  %v223_v11 = vld [vmem:[#allocation5 + $0x148] sm:$0xff]  ;;  %v72_v12 = vld [vmem:[#allocation5 + $0x50] sm:$0xff]  ;;  %v222_v13 = vld [vmem:[#allocation5 + $0x140] sm:$0xff] }
  0x13   :  { %233 = vmatpush.msra.mxu2 %v227_v2  ;;  %v71_v14 = vld [vmem:[#allocation5 + $0x48] sm:$0xff]  ;;  %v221_v15 = vld [vmem:[#allocation5 + $0x138] sm:$0xff]  ;;  %v70_v16 = vld [vmem:[#allocation5 + $0x40] sm:$0xff] }
  0x14   :  { %81 = vmatpush.msra.mxu0 %v75_v6  ;;  %v220_v17 = vld [vmem:[#allocation5 + $0x130] sm:$0xff]  ;;  %v69_v18 = vld [vmem:[#allocation5 + $0x38] sm:$0xff]  ;;  %v219_v19 = vld [vmem:[#allocation5 + $0x128] sm:$0xff] }
  0x15   :  { %234 = vmatpush.msra.mxu2 %v226_v5  ;;  %v68_v20 = vld [vmem:[#allocation5 + $0x30] sm:$0xff]  ;;  %v218_v21 = vld [vmem:[#allocation5 + $0x120] sm:$0xff]  ;;  %v67_v22 = vld [vmem:[#allocation5 + $0x28] sm:$0xff]  ;;  %v568_v43 = vpop.eup %567 }
  0x16   :  { %82 = vmatpush.msra.mxu0 %v74_v8  ;;  %v217_v23 = vld [vmem:[#allocation5 + $0x118] sm:$0xff]  ;;  %v66_v24 = vld [vmem:[#allocation5 + $0x20] sm:$0xff]  ;;  %v216_v25 = vld [vmem:[#allocation5 + $0x110] sm:$0xff]  ;;  %v106_v44 = vmul.f32 128.0, %v568_v43  ;;  %vm110_vm1 = vweird.f32 %v568_v43 }
  0x17   :  { %235 = vmatpush.msra.mxu2 %v225_v7  ;;  %v65_v26 = vld [vmem:[#allocation5 + $0x18] sm:$0xff]  ;;  %v215_v27 = vld [vmem:[#allocation5 + $0x108] sm:$0xff]  ;;  %v64_v28 = vld [vmem:[#allocation5 + $0x10] sm:$0xff] }
  0x18   :  { %83 = vmatpush.msra.mxu0 %v73_v10  ;;  %v214_v29 = vld [vmem:[#allocation5 + $0x100] sm:$0xff]  ;;  %v63_v30 = vld [vmem:[#allocation5 + $0x8] sm:$0xff]  ;;  %v61_v31 = vld [vmem:[#allocation2 + $0x1] sm:$0x1]  ;;  %v107_v45 = vsub.f32 1.0, %v106_v44 }
  0x19   :  { %236 = vmatpush.msra.mxu2 %v224_v9  ;;  %v62_v32 = vld [vmem:[#allocation5] sm:$0xff]  ;;  %v60_v33 = vld [vmem:[#allocation2] sm:$0x1]  ;;  %v335_v60 = vld [vmem:[#allocation5 + $0x1f0] sm:$0xff] }
  0x1a   :  { %84 = vmatpush.msra.mxu0 %v72_v12  ;;  %v230_v34 = vld [vmem:[#allocation7 + $0x4] sm:$0x1]  ;;  %v78_v37 = vld [vmem:[#allocation7] sm:$0x1]  ;;  %v108_v46 = vmul.f32 %v568_v43, %v107_v45  ;;  %v336_v59 = vld [vmem:[#allocation5 + $0x1f8] sm:$0xff] }
  0x1b   :  { %237 = vmatpush.msra.mxu2 %v223_v11  ;;  %338 = vmatpush.msra.mxu3 %v336_v59  ;;  %v192_v61 = vld [vmem:[#allocation5 + $0xf8] sm:$0xff]  ;;  %v334_v63 = vld [vmem:[#allocation5 + $0x1e8] sm:$0xff]  ;;  %v191_v0 = vld [vmem:[#allocation5 + $0xf0] sm:$0xff] }
  0x1c   :  { %85 = vmatpush.msra.mxu0 %v71_v14  ;;  %v109_v47 = vadd.f32 %v568_v43, %v108_v46  ;;  %194 = vmatpush.msra.mxu1 %v192_v61  ;;  %v190_v2 = vld [vmem:[#allocation5 + $0xe8] sm:$0xff]  ;;  %v333_v3 = vld [vmem:[#allocation5 + $0x1e0] sm:$0xff]  ;;  %v332_v6 = vld [vmem:[#allocation5 + $0x1d8] sm:$0xff] }
  0x1d   :  { %238 = vmatpush.msra.mxu2 %v222_v13  ;;  %339 = vmatpush.msra.mxu3 %v335_v60  ;;  %v189_v5 = vld [vmem:[#allocation5 + $0xe0] sm:$0xff]  ;;  %v188_v7 = vld [vmem:[#allocation5 + $0xd8] sm:$0xff]  ;;  %v331_v8 = vld [vmem:[#allocation5 + $0x1d0] sm:$0xff] }
  0x1e   :  { %86 = vmatpush.msra.mxu0 %v70_v16  ;;  %v721_v48 = vsel %vm110_vm1, %v568_v43, %v109_v47  ;;  %195 = vmatpush.msra.mxu1 %v191_v0  ;;  %v187_v9 = vld [vmem:[#allocation5 + $0xd0] sm:$0xff]  ;;  %v330_v11 = vld [vmem:[#allocation5 + $0x1c8] sm:$0xff]  ;;  %v329_v14 = vld [vmem:[#allocation5 + $0x1c0] sm:$0xff] }
  0x1f   :  { %239 = vmatpush.msra.mxu2 %v221_v15  ;;  %340 = vmatpush.msra.mxu3 %v334_v63  ;;  %v186_v13 = vld [vmem:[#allocation5 + $0xc8] sm:$0xff]  ;;  %v321_v44 = vld [vmem:[#allocation5 + $0x180] sm:$0xff] }
  0x20   :  { %87 = vmatpush.msra.mxu0 %v69_v18  ;;  %196 = vmatpush.msra.mxu1 %v190_v2 }
  0x21   :  { %240 = vmatpush.msra.mxu2 %v220_v17  ;;  %341 = vmatpush.msra.mxu3 %v333_v3  ;;  %v185_v17 = vld [vmem:[#allocation5 + $0xc0] sm:$0xff] }
  0x22   :  { %88 = vmatpush.msra.mxu0 %v68_v20  ;;  %197 = vmatpush.msra.mxu1 %v189_v5  ;;  %v184_v20 = vld [vmem:[#allocation5 + $0xb8] sm:$0xff] }
  0x23   :  { %241 = vmatpush.msra.mxu2 %v219_v19  ;;  %342 = vmatpush.msra.mxu3 %v332_v6  ;;  %v328_v19 = vld [vmem:[#allocation5 + $0x1b8] sm:$0xff] }
  0x24   :  { %89 = vmatpush.msra.mxu0 %v67_v22  ;;  %198 = vmatpush.msra.mxu1 %v188_v7  ;;  %v327_v22 = vld [vmem:[#allocation5 + $0x1b0] sm:$0xff] }
  0x25   :  { %242 = vmatpush.msra.mxu2 %v218_v21  ;;  %343 = vmatpush.msra.mxu3 %v331_v8 }
  0x26   :  { %90 = vmatpush.msra.mxu0 %v66_v24  ;;  %199 = vmatpush.msra.mxu1 %v187_v9 }
  0x27   :  { %243 = vmatpush.msra.mxu2 %v217_v23  ;;  %344 = vmatpush.msra.mxu3 %v330_v11  ;;  %v183_v23 = vld [vmem:[#allocation5 + $0xb0] sm:$0xff] }
  0x28   :  { %91 = vmatpush.msra.mxu0 %v65_v26  ;;  %200 = vmatpush.msra.mxu1 %v186_v13  ;;  %v182_v26 = vld [vmem:[#allocation5 + $0xa8] sm:$0xff]  ;;  %v179_v13 = vld [vmem:[#allocation5 + $0x90] sm:$0xff] }
  0x29   :  { %244 = vmatpush.msra.mxu2 %v216_v25  ;;  %345 = vmatpush.msra.mxu3 %v329_v14  ;;  %v326_v25 = vld [vmem:[#allocation5 + $0x1a8] sm:$0xff] }
  0x2a   :  { %92 = vmatpush.msra.mxu0 %v64_v28  ;;  %201 = vmatpush.msra.mxu1 %v185_v17  ;;  %v325_v28 = vld [vmem:[#allocation5 + $0x1a0] sm:$0xff] }
  0x2b   :  { %245 = vmatpush.msra.mxu2 %v215_v27  ;;  %346 = vmatpush.msra.mxu3 %v328_v19 }
  0x2c   :  { %93 = vmatpush.msra.mxu0 %v63_v30  ;;  %202 = vmatpush.msra.mxu1 %v184_v20  ;;  %v181_v30 = vld [vmem:[#allocation5 + $0xa0] sm:$0xff] }
  0x2d   :  { %246 = vmatpush.msra.mxu2 %v214_v29  ;;  %347 = vmatpush.msra.mxu3 %v327_v22  ;;  %v177_v22 = vld [vmem:[#allocation5 + $0x80] sm:$0xff] }
  0x2e   :  { %247 = vmatmul.f32.vlgmr.msra.gmra.mxu2 %v61_v31  ;;  %94 = vmatpush.msra.mxu0 %v62_v32 }
  0x2f   :  { %95 = vmatmul.f32.vlgmr.msra.gmra.mxu0 %v60_v33  ;;  %203 = vmatpush.msra.mxu1 %v183_v23  ;;  %v324_v33 = vld [vmem:[#allocation5 + $0x198] sm:$0xff] }
  0x30   :  { %348 = vmatpush.msra.mxu3 %v326_v25 }
  0x31   :  { %204 = vmatpush.msra.mxu1 %v182_v26 }
  0x32   :  { %349 = vmatpush.msra.mxu3 %v325_v28 }
  0x33   :  { %205 = vmatpush.msra.mxu1 %v181_v30  ;;  %v373_v30 = vld [vmem:[#allocation5 + $0x278] sm:$0xff] }
  0x34   :  { %350 = vmatpush.msra.mxu3 %v324_v33  ;;  %391 = vmatpush.msrb.mxu0 %v373_v30  ;;  %v377_v30 = vld [vmem:[#allocation5 + $0x298] sm:$0xff] }
  0xac   :  { %v96_v38 = vpop.f32.mrf.mxu0 }
  0xad   :  { %v97_v40 = vadd.f32 %v96_v38, %v78_v37  ;;  %v251_v37 = vld [vmem:[#allocation7 + $0x5] sm:$0x1] }
  0xaf   :  { %v102_v41 = vsel %vm101_vm0, %v97_v40, 0.0 }
  0xb1   :  { %v248_v35 = vpop.f32.mrf.mxu2 }
  0xb2   :  { %v249_v36 = vadd.f32 %v248_v35, %v230_v34 }
  0xb4   :  { %v253_v39 = vsel %vm101_vm0, %v249_v36, 0.0 }
  0xb5   :  { %254 = vadd.xlane.f32.xlu0 %v253_v39 }
  0xbd   :  { %103 = vadd.xlane.f32.xlu0 %v102_v41  ;;  %v252_v41 = vld [vmem:[#allocation7 + $0x6] sm:$0x1] }
 0x128   :  { %v255_v49 = vpop.xlane.xlu0 %254 }
 0x129   :  { %v256_v50 = vmul.f32 %v255_v49, %v721_v48 }
 0x12b   :  { %v724_v51 = vsub.f32 %v249_v36, %v256_v50  ;;  %v323_v36 = vld [vmem:[#allocation5 + $0x190] sm:$0xff]  ;;  %v99_v50 = vld [vmem:[#allocation7 + $0x1] sm:$0x1] }
 0x12c   :  { %351 = vmatpush.msra.mxu3 %v323_v36  ;;  %v387_v36 = vld [vmem:[#allocation5 + $0x2e8] sm:$0xff] }
 0x12d   :  { %v258_v52 = vmul.f32 %v724_v51, %v724_v51 }
 0x12f   :  { %v259_v53 = vsel %vm101_vm0, %v258_v52, 0.0 }
 0x130   :  { %260 = vadd.xlane.f32.xlu1 %v259_v53  ;;  %v104_v54 = vpop.xlane.xlu0 %103  ;;  %v100_v53 = vld [vmem:[#allocation7 + $0x2] sm:$0x1] }
 0x131   :  { %v112_v55 = vmul.f32 %v721_v48, %v104_v54 }
 0x133   :  { %v730_v56 = vsub.f32 %v97_v40, %v112_v55  ;;  %v322_v40 = vld [vmem:[#allocation5 + $0x188] sm:$0xff] }
 0x134   :  { %352 = vmatpush.msra.mxu3 %v322_v40  ;;  %v386_v40 = vld [vmem:[#allocation5 + $0x2e0] sm:$0xff] }
 0x135   :  { %v114_v57 = vmul.f32 %v730_v56, %v730_v56 }
 0x136   :  { %353 = vmatpush.msra.mxu3 %v321_v44 }
 0x137   :  { %v115_v58 = vsel %vm101_vm0, %v114_v57, 0.0 }
 0x138   :  { %116 = vadd.xlane.f32.xlu1 %v115_v58 }
 0x1a3   :  { %v261_v62 = vpop.xlane.xlu1 %260 }
 0x1a4   :  { %v262_v1 = vmul.f32 %v261_v62, %v721_v48 }
 0x1a6   :  { %v263_v4 = vadd.f32 1e-05, %v262_v1 }
 0x1a8   :  { %569 = vrsqrt.f32 %v263_v4  ;;  %vm270_vm3 = vweird.f32 %v263_v4 }
 0x1ab   :  { %v117_v10 = vpop.xlane.xlu1 %116 }
 0x1ac   :  { %v118_v12 = vmul.f32 %v117_v10, %v721_v48 }
 0x1ae   :  { %v570_v15 = vpop.eup %569  ;;  %v119_v16 = vadd.f32 1e-05, %v118_v12  ;;  %v180_v12 = vld [vmem:[#allocation5 + $0x98] sm:$0xff] }
 0x1af   :  { %v265_v18 = vmul.f32 %v570_v15, %v263_v4  ;;  %vm271_vm2 = vweird.f32 %v570_v15  ;;  %206 = vmatpush.msra.mxu1 %v180_v12 }
 0x1b0   :  { %571 = vrsqrt.f32 %v119_v16  ;;  %vm272_vm4 = vmor %vm270_vm3, %vm271_vm2  ;;  %vm126_vm6 = vweird.f32 %v119_v16 }
 0x1b1   :  { %v266_v21 = vmul.f32 %v570_v15, %v265_v18  ;;  %v178_v18 = vld [vmem:[#allocation5 + $0x88] sm:$0xff]  ;;  %207 = vmatpush.msra.mxu1 %v179_v13 }
 0x1b3   :  { %v267_v24 = vmul.f32 0.5, %v266_v21  ;;  %208 = vmatpush.msra.mxu1 %v178_v18 }
 0x1b5   :  { %v268_v27 = vsub.f32 1.5, %v267_v24  ;;  %209 = vmatpush.msra.mxu1 %v177_v22 }
 0x1b6   :  { %v572_v29 = vpop.eup %571 }
 0x1b7   :  { %v269_v31 = vmul.f32 %v570_v15, %v268_v27  ;;  %v121_v32 = vmul.f32 %v572_v29, %v119_v16  ;;  %vm127_vm5 = vweird.f32 %v572_v29 }
 0x1b8   :  { %vm128_vm7 = vmor %vm126_vm6, %vm127_vm5 }
 0x1b9   :  { %v273_v34 = vsel %vm272_vm4, %v570_v15, %v269_v31  ;;  %v122_v35 = vmul.f32 %v572_v29, %v121_v32  ;;  %v388_v31 = vld [vmem:[#allocation5 + $0x2f0] sm:$0xff] }
 0x1ba   :  { %v274_v38 = vmul.f32 %v273_v34, %v724_v51  ;;  %v372_v34 = vld [vmem:[#allocation5 + $0x270] sm:$0xff] }
 0x1bb   :  { %v123_v39 = vmul.f32 0.5, %v122_v35  ;;  %392 = vmatpush.msrb.mxu0 %v372_v34 }
 0x1bc   :  { %v275_v42 = vmul.f32 %v274_v38, %v251_v37  ;;  %v371_v37 = vld [vmem:[#allocation5 + $0x268] sm:$0xff] }
 0x1bd   :  { %v124_v43 = vsub.f32 1.5, %v123_v39  ;;  %393 = vmatpush.msrb.mxu0 %v371_v37 }
 0x1be   :  { %v738_v45 = vadd.f32 %v275_v42, %v252_v41  ;;  %v370_v41 = vld [vmem:[#allocation5 + $0x260] sm:$0xff] }
 0x1bf   :  { %v125_v46 = vmul.f32 %v572_v29, %v124_v43  ;;  %394 = vmatpush.msrb.mxu0 %v370_v41  ;;  %v358_v41 = vld [vmem:[#allocation5 + $0x200] sm:$0xff] }
 0x1c0   :  { %v741_v47 = vmul.f32 0.70710677, %v738_v45 }
 0x1c1   :  { %v129_v49 = vsel %vm128_vm7, %v572_v29, %v125_v46  ;;  %v389_v29 = vld [vmem:[#allocation5 + $0x2f8] sm:$0xff] }
 0x1c2   :  { %v279_v51 = vmul.f32 %v741_v47, %v741_v47  ;;  %v130_v52 = vmul.f32 %v129_v49, %v730_v56  ;;  %411 = vmatpush.msrb.mxu1 %v389_v29  ;;  %v385_v49 = vld [vmem:[#allocation5 + $0x2d8] sm:$0xff] }
 0x1c4   :  { %v280_v54 = vmin.f32 %v279_v51, 16.0  ;;  %v131_v55 = vmul.f32 %v130_v52, %v99_v50  ;;  %412 = vmatpush.msrb.mxu1 %v388_v31  ;;  %v369_v50 = vld [vmem:[#allocation5 + $0x258] sm:$0xff] }
 0x1c5   :  { %395 = vmatpush.msrb.mxu0 %v369_v50  ;;  %v361_v31 = vld [vmem:[#allocation5 + $0x218] sm:$0xff]  ;;  %v390_v50 = vld [vmem:[#allocation7 + $0x8] sm:$0x1] }
 0x1c6   :  { %v281_v57 = vmul.f32 2.1237322e-06, %v280_v54  ;;  %v292_v58 = vmul.f32 3.8918573e-05, %v280_v54  ;;  %v746_v59 = vadd.f32 %v131_v55, %v100_v53  ;;  %413 = vmatpush.msrb.mxu1 %v387_v36  ;;  %v384_v53 = vld [vmem:[#allocation5 + $0x2d0] sm:$0xff] }
 0x1c7   :  { %v368_v55 = vld [vmem:[#allocation5 + $0x250] sm:$0xff] }
 0x1c8   :  { %v282_v60 = vadd.f32 0.00028619796, %v281_v57  ;;  %v293_v61 = vadd.f32 0.001143296, %v292_v58  ;;  %v749_v62 = vmul.f32 0.70710677, %v746_v59  ;;  %414 = vmatpush.msrb.mxu1 %v386_v40  ;;  %396 = vmatpush.msrb.mxu0 %v368_v55 }
 0x1c9   :  { %v374_v40 = vld [vmem:[#allocation5 + $0x280] sm:$0xff] }
 0x1ca   :  { %v283_v63 = vmul.f32 %v282_v60, %v280_v54  ;;  %v294_v0 = vmul.f32 %v293_v61, %v280_v54  ;;  %v135_v1 = vmul.f32 %v749_v62, %v749_v62  ;;  %415 = vmatpush.msrb.mxu1 %v385_v49  ;;  %v383_v61 = vld [vmem:[#allocation5 + $0x2c8] sm:$0xff] }
 0x1cc   :  { %v295_v2 = vadd.f32 0.014752088, %v294_v0  ;;  %v284_v3 = vadd.f32 0.0036580483, %v283_v63  ;;  %v753_v56 = vmin.f32 %v135_v1, 16.0  ;;  %v367_v63 = vld [vmem:[#allocation5 + $0x248] sm:$0xff]  ;;  %416 = vmatpush.msrb.mxu1 %v384_v53 }
 0x1cd   :  { %397 = vmatpush.msrb.mxu0 %v367_v63 }
 0x1ce   :  { %v296_v4 = vmul.f32 %v295_v2, %v280_v54  ;;  %v137_v5 = vmul.f32 2.1237322e-06, %v753_v56  ;;  %v148_v6 = vmul.f32 3.8918573e-05, %v753_v56  ;;  %v285_v8 = vmul.f32 %v284_v3, %v280_v54  ;;  %v382_v2 = vld [vmem:[#allocation5 + $0x2c0] sm:$0xff]  ;;  %417 = vmatpush.msrb.mxu1 %v383_v61 }
 0x1cf   :  { %v366_v3 = vld [vmem:[#allocation5 + $0x240] sm:$0xff] }
 0x1d0   :  { %v297_v7 = vadd.f32 0.112945676, %v296_v4  ;;  %v138_v9 = vadd.f32 0.00028619796, %v137_v5  ;;  %v149_v10 = vadd.f32 0.001143296, %v148_v6  ;;  %418 = vmatpush.msrb.mxu1 %v382_v2  ;;  %398 = vmatpush.msrb.mxu0 %v366_v3 }
 0x1d1   :  { %v286_v17 = vadd.f32 0.05243302, %v285_v8  ;;  %v514_v2 = vld [vmem:[#allocation5 + $0x368] sm:$0xff]  ;;  %v513_v3 = vld [vmem:[#allocation5 + $0x360] sm:$0xff] }
 0x1d2   :  { %v298_v11 = vmul.f32 %v297_v7, %v280_v54  ;;  %v139_v14 = vmul.f32 %v138_v9, %v753_v56  ;;  %v150_v15 = vmul.f32 %v149_v10, %v753_v56  ;;  %v381_v10 = vld [vmem:[#allocation5 + $0x2b8] sm:$0xff] }
 0x1d3   :  { %v287_v25 = vmul.f32 %v286_v17, %v280_v54  ;;  %419 = vmatpush.msrb.mxu1 %v381_v10  ;;  %v509_v10 = vld [vmem:[#allocation5 + $0x340] sm:$0xff] }
 0x1d4   :  { %v299_v16 = vadd.f32 0.4994258, %v298_v11  ;;  %v151_v19 = vadd.f32 0.014752088, %v150_v15  ;;  %v140_v21 = vadd.f32 0.0036580483, %v139_v14 }
 0x1d5   :  { %v288_v32 = vadd.f32 0.18741608, %v287_v25  ;;  %v365_v11 = vld [vmem:[#allocation5 + $0x238] sm:$0xff]  ;;  %v380_v14 = vld [vmem:[#allocation5 + $0x2b0] sm:$0xff] }
 0x1d6   :  { %v300_v20 = vmul.f32 %v299_v16, %v280_v54  ;;  %v152_v23 = vmul.f32 %v151_v19, %v753_v56  ;;  %v141_v27 = vmul.f32 %v140_v21, %v753_v56  ;;  %v364_v15 = vld [vmem:[#allocation5 + $0x230] sm:$0xff]  ;;  %399 = vmatpush.msrb.mxu0 %v365_v11  ;;  %v379_v19 = vld [vmem:[#allocation5 + $0x2a8] sm:$0xff]  ;;  %v277_v21 = vmul.f32 0.5, %v738_v45  ;;  %420 = vmatpush.msrb.mxu1 %v380_v14  ;;  %v508_v11 = vld [vmem:[#allocation5 + $0x338] sm:$0xff] }
 0x1d7   :  { %v289_v42 = vmul.f32 %v288_v32, %v280_v54 }
 0x1d8   :  { %v301_v24 = vadd.f32 1.0, %v300_v20  ;;  %v153_v26 = vadd.f32 0.112945676, %v152_v23  ;;  %v142_v35 = vadd.f32 0.05243302, %v141_v27  ;;  %v363_v20 = vld [vmem:[#allocation5 + $0x228] sm:$0xff]  ;;  %400 = vmatpush.msrb.mxu0 %v364_v15  ;;  %421 = vmatpush.msrb.mxu1 %v379_v19 }
 0x1d9   :  { %v290_v57 = vadd.f32 1.1283791, %v289_v42  ;;  %v362_v27 = vld [vmem:[#allocation5 + $0x220] sm:$0xff] }
 0x1da   :  { %573 = vrcp.f32 %v301_v24  ;;  %v154_v28 = vmul.f32 %v153_v26, %v753_v56  ;;  %v143_v46 = vmul.f32 %v142_v35, %v753_v56  ;;  %v313_v52 = vand.u32 2147483648, %v301_v24  ;;  %401 = vmatpush.msrb.mxu0 %v363_v20  ;;  %v337_v42 = vld [vmem:[#allocation7 + $0x7] sm:$0x1] }
 0x1db   :  { %v311_v54 = vand.u32 2147483647, %v301_v24  ;;  %vm307_vm9 = vweird.f32 %v301_v24  ;;  %v291_v5 = vmul.f32 %v290_v57, %v741_v47  ;;  %v133_v35 = vmul.f32 0.5, %v746_v59  ;;  %v505_v15 = vld [vmem:[#allocation5 + $0x320] sm:$0xff] }
 0x1dc   :  { %v155_v33 = vadd.f32 0.4994258, %v154_v28  ;;  %v144_v60 = vadd.f32 0.18741608, %v143_v46  ;;  %v314_v1 = vor.u32 1.1754944e-38, %v313_v52  ;;  %402 = vmatpush.msrb.mxu0 %v362_v27  ;;  %v501_v20 = vld [vmem:[#allocation5 + $0x300] sm:$0xff] }
 0x1dd   :  { %vm312_vm11 = vcmp.eq.f32.partialorder %v311_v54, 8.507059e+37  ;;  %v193_v46 = vld [vmem:[#allocation7 + $0x3] sm:$0x1] }
 0x1de   :  { %v156_v38 = vmul.f32 %v155_v33, %v753_v56  ;;  %v145_v8 = vmul.f32 %v144_v60, %v753_v56  ;;  %v376_v33 = vld [vmem:[#allocation5 + $0x290] sm:$0xff]  ;;  %403 = vmatpush.msrb.mxu0 %v361_v31 }
 0x1e0   :  { %v574_v39 = vpop.eup %573  ;;  %v763_v44 = vadd.f32 1.0, %v156_v38  ;;  %v146_v17 = vadd.f32 1.1283791, %v145_v8  ;;  %v375_v38 = vld [vmem:[#allocation5 + $0x288] sm:$0xff] }
 0x1e1   :  { %v303_v43 = vmul.f32 %v574_v39, %v301_v24  ;;  %vm308_vm8 = vweird.f32 %v574_v39  ;;  %v378_v24 = vld [vmem:[#allocation5 + $0x2a0] sm:$0xff]  ;;  %v510_v8 = vld [vmem:[#allocation5 + $0x348] sm:$0xff] }
 0x1e2   :  { %575 = vrcp.f32 %v763_v44  ;;  %vm309_vm10 = vmor %vm307_vm9, %vm308_vm8  ;;  %v169_v47 = vand.u32 2147483648, %v763_v44  ;;  %v167_v56 = vand.u32 2147483647, %v763_v44  ;;  %vm163_vm13 = vweird.f32 %v763_v44  ;;  %422 = vmatpush.msrb.mxu1 %v378_v24 }
 0x1e3   :  { %v304_v51 = vsub.f32 1.0, %v303_v43  ;;  %v147_v28 = vmul.f32 %v146_v17, %v749_v62  ;;  %v360_v62 = vld [vmem:[#allocation5 + $0x210] sm:$0xff] }
 0x1e4   :  { %v170_v26 = vor.u32 1.1754944e-38, %v169_v47  ;;  %vm168_vm15 = vcmp.eq.f32.partialorder %v167_v56, 8.507059e+37  ;;  %423 = vmatpush.msrb.mxu1 %v377_v30  ;;  %404 = vmatpush.msrb.mxu0 %v360_v62  ;;  %v504_v47 = vld [vmem:[#allocation5 + $0x318] sm:$0xff]  ;;  %v502_v56 = vld [vmem:[#allocation5 + $0x308] sm:$0xff] }
 0x1e5   :  { %v305_v58 = vmul.f32 %v574_v39, %v304_v51 }
 0x1e6   :  { %424 = vmatpush.msrb.mxu1 %v376_v33 }
 0x1e7   :  { %v306_v0 = vadd.f32 %v574_v39, %v305_v58 }
 0x1e8   :  { %v576_v4 = vpop.eup %575  ;;  %425 = vmatpush.msrb.mxu1 %v375_v38 }
 0x1e9   :  { %v310_v6 = vsel %vm309_vm10, %v574_v39, %v306_v0  ;;  %v159_v9 = vmul.f32 %v576_v4, %v763_v44  ;;  %vm164_vm12 = vweird.f32 %v576_v4  ;;  %v359_v39 = vld [vmem:[#allocation5 + $0x208] sm:$0xff]  ;;  %v516_v0 = vld [vmem:[#allocation5 + $0x378] sm:$0xff] }
 0x1ea   :  { %v315_v7 = vsel %vm312_vm11, %v314_v1, %v310_v6  ;;  %vm165_vm14 = vmor %vm163_vm13, %vm164_vm12  ;;  %405 = vmatpush.msrb.mxu0 %v359_v39  ;;  %426 = vmatpush.msrb.mxu1 %v374_v40  ;;  %v515_v1 = vld [vmem:[#allocation5 + $0x370] sm:$0xff] }
 0x1eb   :  { %v316_v12 = vmul.f32 %v315_v7, %v291_v5  ;;  %v160_v13 = vsub.f32 1.0, %v159_v9  ;;  %518 = vmatpush.msrb.mxu2 %v516_v0  ;;  %v511_v5 = vld [vmem:[#allocation5 + $0x350] sm:$0xff] }
 0x1ec   :  { %406 = vmatpush.msrb.mxu0 %v358_v41 }
 0x1ed   :  { %v558_v16 = vclamps-f32 %v316_v12, 1.0  ;;  %v161_v18 = vmul.f32 %v576_v4, %v160_v13  ;;  %519 = vmatpush.msrb.mxu2 %v515_v1  ;;  %v507_v12 = vld [vmem:[#allocation5 + $0x330] sm:$0xff]  ;;  %v506_v13 = vld [vmem:[#allocation5 + $0x328] sm:$0xff] }
 0x1ef   :  { %v319_v22 = vadd.f32 1.0, %v558_v16  ;;  %v162_v23 = vadd.f32 %v576_v4, %v161_v18  ;;  %520 = vmatpush.msrb.mxu2 %v514_v2 }
 0x1f1   :  { %v320_v25 = vmul.f32 %v319_v22, %v277_v21  ;;  %v166_v29 = vsel %vm165_vm14, %v576_v4, %v162_v23  ;;  %v512_v4 = vld [vmem:[#allocation5 + $0x358] sm:$0xff]  ;;  %521 = vmatpush.msrb.mxu2 %v513_v3  ;;  %v431_v23 = vld [vmem:[#allocation7 + $0x9] sm:$0x1] }
 0x1f2   :  { %v171_v45 = vsel %vm168_vm15, %v170_v26, %v166_v29 }
 0x1f3   :  { %354 = vmatmul.f32.vlgmr.msra.gmra.mxu3 %v320_v25  ;;  %v172_v32 = vmul.f32 %v171_v45, %v147_v28  ;;  %522 = vmatpush.msrb.mxu2 %v512_v4  ;;  %v432_v25 = vld [vmem:[#allocation7 + $0xa] sm:$0x1] }
 0x1f5   :  { %v557_v34 = vclamps-f32 %v172_v32, 1.0  ;;  %523 = vmatpush.msrb.mxu2 %v511_v5 }
 0x1f7   :  { %v175_v36 = vadd.f32 1.0, %v557_v34  ;;  %524 = vmatpush.msrb.mxu2 %v510_v8 }
 0x1f9   :  { %v176_v37 = vmul.f32 %v175_v36, %v133_v35  ;;  %525 = vmatpush.msrb.mxu2 %v509_v10 }
 0x1fb   :  { %210 = vmatmul.f32.vlgmr.msra.gmra.mxu1 %v176_v37  ;;  %526 = vmatpush.msrb.mxu2 %v508_v11 }
 0x1fd   :  { %527 = vmatpush.msrb.mxu2 %v507_v12 }
 0x1ff   :  { %528 = vmatpush.msrb.mxu2 %v506_v13 }
 0x201   :  { %529 = vmatpush.msrb.mxu2 %v505_v15 }
 0x203   :  { %530 = vmatpush.msrb.mxu2 %v504_v47 }
 0x276   :  { %v355_v43 = vpop.f32.mrf.mxu3 }
 0x277   :  { %v356_v44 = vadd.f32 %v355_v43, %v337_v42 }
 0x278   :  { %v211_v49 = vpop.f32.mrf.mxu1 }
 0x279   :  { %427 = vmatmul.f32.vlgmr.msrb.gmra.mxu1 %v356_v44  ;;  %v212_v59 = vadd.f32 %v211_v49, %v193_v46 }
 0x27b   :  { %407 = vmatmul.f32.vlgmr.msrb.gmra.mxu0 %v212_v59 }
 0x2f6   :  { %v428_v53 = vpop.f32.mrf.mxu1 }
 0x2f8   :  { %v408_v51 = vpop.f32.mrf.mxu0 }
 0x2f9   :  { %v409_v52 = vadd.f32 %v408_v51, %v390_v50 }
 0x2fb   :  { %v429_v55 = vadd.f32 %v428_v53, %v409_v52 }
 0x2fd   :  { %v433_v57 = vsel %vm101_vm0, %v429_v55, 0.0 }
 0x2fe   :  { %434 = vadd.xlane.f32.xlu2 %v433_v57 }
 0x371   :  { %v435_v58 = vpop.xlane.xlu2 %434 }
 0x372   :  { %v436_v54 = vmul.f32 %v435_v58, %v721_v48 }
 0x374   :  { %v437_v60 = vsub.f32 %v429_v55, %v436_v54 }
 0x376   :  { %v438_v61 = vmul.f32 %v437_v60, %v437_v60 }
 0x378   :  { %v439_v63 = vsel %vm101_vm0, %v438_v61, 0.0 }
 0x379   :  { %440 = vadd.xlane.f32.xlu2 %v439_v63 }
 0x3ec   :  { %v441_v6 = vpop.xlane.xlu2 %440 }
 0x3ed   :  { %v442_v7 = vmul.f32 %v441_v6, %v721_v48  ;;  %v503_v48 = vld [vmem:[#allocation5 + $0x310] sm:$0xff]  ;;  %v517_v6 = vld [vmem:[#allocation7 + $0xb] sm:$0x1] }
 0x3ee   :  { %531 = vmatpush.msrb.mxu2 %v503_v48 }
 0x3ef   :  { %v443_v9 = vadd.f32 1e-05, %v442_v7 }
 0x3f0   :  { %532 = vmatpush.msrb.mxu2 %v502_v56 }
 0x3f1   :  { %577 = vrsqrt.f32 %v443_v9  ;;  %vm450_vm1 = vweird.f32 %v443_v9 }
 0x3f2   :  { %533 = vmatpush.msrb.mxu2 %v501_v20 }
 0x3f7   :  { %v578_v14 = vpop.eup %577 }
 0x3f8   :  { %v445_v16 = vmul.f32 %v578_v14, %v443_v9  ;;  %vm451_vm0 = vweird.f32 %v578_v14 }
 0x3f9   :  { %vm452_vm2 = vmor %vm450_vm1, %vm451_vm0 }
 0x3fa   :  { %v446_v17 = vmul.f32 %v578_v14, %v445_v16 }
 0x3fc   :  { %v447_v18 = vmul.f32 0.5, %v446_v17 }
 0x3fe   :  { %v448_v19 = vsub.f32 1.5, %v447_v18 }
 0x400   :  { %v449_v21 = vmul.f32 %v578_v14, %v448_v19 }
 0x402   :  { %v453_v22 = vsel %vm452_vm2, %v578_v14, %v449_v21 }
 0x403   :  { %v454_v24 = vmul.f32 %v453_v22, %v437_v60 }
 0x405   :  { %v455_v26 = vmul.f32 %v454_v24, %v431_v23 }
 0x407   :  { %v456_v27 = vadd.f32 %v455_v26, %v432_v25 }
 0x409   :  { %v458_v28 = vmul.f32 0.70710677, %v456_v27  ;;  %v457_v3 = vmul.f32 0.5, %v456_v27 }
 0x40b   :  { %v459_v29 = vmul.f32 %v458_v28, %v458_v28 }
 0x40d   :  { %v460_v30 = vmin.f32 %v459_v29, 16.0 }
 0x40f   :  { %v461_v45 = vmul.f32 2.1237322e-06, %v460_v30  ;;  %v472_v31 = vmul.f32 3.8918573e-05, %v460_v30 }
 0x411   :  { %v462_v32 = vadd.f32 0.00028619796, %v461_v45  ;;  %v473_v33 = vadd.f32 0.001143296, %v472_v31 }
 0x413   :  { %v463_v34 = vmul.f32 %v462_v32, %v460_v30  ;;  %v474_v35 = vmul.f32 %v473_v33, %v460_v30 }
 0x415   :  { %v475_v36 = vadd.f32 0.014752088, %v474_v35  ;;  %v464_v37 = vadd.f32 0.0036580483, %v463_v34 }
 0x417   :  { %v476_v62 = vmul.f32 %v475_v36, %v460_v30  ;;  %v465_v39 = vmul.f32 %v464_v37, %v460_v30 }
 0x419   :  { %v477_v38 = vadd.f32 0.112945676, %v476_v62  ;;  %v466_v42 = vadd.f32 0.05243302, %v465_v39 }
 0x41b   :  { %v478_v40 = vmul.f32 %v477_v38, %v460_v30  ;;  %v467_v46 = vmul.f32 %v466_v42, %v460_v30 }
 0x41d   :  { %v479_v41 = vadd.f32 0.4994258, %v478_v40  ;;  %v468_v49 = vadd.f32 0.18741608, %v467_v46 }
 0x41f   :  { %v480_v43 = vmul.f32 %v479_v41, %v460_v30  ;;  %v469_v50 = vmul.f32 %v468_v49, %v460_v30 }
 0x421   :  { %v481_v44 = vadd.f32 1.0, %v480_v43  ;;  %v470_v55 = vadd.f32 1.1283791, %v469_v50 }
 0x423   :  { %579 = vrcp.f32 %v481_v44  ;;  %v493_v53 = vand.u32 2147483648, %v481_v44  ;;  %v491_v58 = vand.u32 2147483647, %v481_v44  ;;  %vm487_vm4 = vweird.f32 %v481_v44 }
 0x424   :  { %v471_v61 = vmul.f32 %v470_v55, %v458_v28 }
 0x425   :  { %v494_v60 = vor.u32 1.1754944e-38, %v493_v53  ;;  %vm492_vm6 = vcmp.eq.f32.partialorder %v491_v58, 8.507059e+37 }
 0x429   :  { %v580_v59 = vpop.eup %579 }
 0x42a   :  { %v483_v51 = vmul.f32 %v580_v59, %v481_v44  ;;  %vm488_vm3 = vweird.f32 %v580_v59 }
 0x42b   :  { %vm489_vm5 = vmor %vm487_vm4, %vm488_vm3 }
 0x42c   :  { %v484_v52 = vsub.f32 1.0, %v483_v51 }
 0x42e   :  { %v485_v57 = vmul.f32 %v580_v59, %v484_v52 }
 0x430   :  { %v486_v54 = vadd.f32 %v580_v59, %v485_v57 }
 0x432   :  { %v490_v63 = vsel %vm489_vm5, %v580_v59, %v486_v54 }
 0x433   :  { %v495_v0 = vsel %vm492_vm6, %v494_v60, %v490_v63 }
 0x434   :  { %v496_v1 = vmul.f32 %v495_v0, %v471_v61 }
 0x436   :  { %v559_v2 = vclamps-f32 %v496_v1, 1.0 }
 0x438   :  { %v499_v4 = vadd.f32 1.0, %v559_v2 }
 0x43a   :  { %v500_v5 = vmul.f32 %v499_v4, %v457_v3 }
 0x43c   :  { %534 = vmatmul.f32.vlgmr.msrb.gmra.mxu2 %v500_v5 }
 0x4bf   :  { %v535_v7 = vpop.f32.mrf.mxu2 }
 0x4c0   :  { %v536_v8 = vadd.f32 %v535_v7, %v517_v6 }
 0x4c2   :  { %538 = vst [vmem:[#allocation8] sm:$0x1] %v536_v8 }
 0x4c3   :  { %549 = dma.vmem_to_hbm [thread:$0]  %s545_s2, 16, %s547_s30, [#allocation4]  }
 0x4c4   :  { %681 = dma.done.wait [#allocation4], 16  }
 0x4c5   :  { %682 = vsyncadd [#allocation4], 4294967280 }
 0x4c6   :  { %554 = vsyncpa [#allocation3], 1 }
 0x4c7   :  { %555 = vsyncpa [#allocation6], 1 }
 0x4c8   :  { %556 = vsyncpa [#allocation4], 1 }

</bundles_post_ra>
